<compile_context>
chip_gen: v5e
topology: v5e:2x2
jax: 0.10.0
libtpu: 0.0.40
codegen_flags: <defaults>
</compile_context>

<pallas_src>
import jax
import jax.numpy as jnp
import numpy as np
from jax import lax
from jax.experimental import pallas as pl
from jax.experimental.pallas import tpu as pltpu


# ----------------------------- Pallas kernel -----------------------------

def _make_shuffle_unit_kernel(N, Cb, H, W):
    HW = H * W

    def kernel(x_ref, w_ref, m_ref, o_ref):
        # Packed BN-folded params: [w1t | w3t | wd | b1 | bd | b3]
        wpack = w_ref[...]                        # (Cb, 2*Cb + 12), loaded once
        w1 = wpack[:, :Cb]                        # (Cb, Cb)  (Cout, Cin)
        w3 = wpack[:, Cb:2 * Cb]                  # (Cb, Cb)
        wd = wpack[:, 2 * Cb:2 * Cb + 9]          # (Cb, 9), tap t = (dy+1)*3+(dx+1)
        b1 = wpack[:, 2 * Cb + 9:2 * Cb + 10]     # (Cb, 1)
        bd = wpack[:, 2 * Cb + 10:2 * Cb + 11]    # (Cb, 1)
        b3 = wpack[:, 2 * Cb + 11:2 * Cb + 12]    # (Cb, 1)
        masks = m_ref[...]                        # (9, HW) f32 in-image masks

        # Small static batch: fully unrolled; weights/masks hoisted above.
        for n in range(N):
            x2 = x_ref[n, Cb:, :]                 # (Cb, HW), lane-dense

            # ---- 1x1 conv (BN folded) + ReLU : channel matmul on the MXU ----
            # NOTE: at production ShuffleNetV2 widths pad Cb to a multiple of 8
            # and consider bf16 operands on v6e/v7x; at Cb=8 the matmul is not
            # the bottleneck.
            h1 = jnp.dot(w1, x2, preferred_element_type=jnp.float32)
            h1 = jnp.maximum(h1 + b1, 0.0)

            # ---- depthwise 3x3, stride 1, pad 1 (BN folded, no activation) ----
            # 9 taps via circular lane rolls (XLU slot) + precomputed masks;
            # zero padding emulated by zeroing out-of-image source pixels.
            acc = h1 * wd[:, 4:5]                 # center tap (mask == 1)
            for dy in (-1, 0, 1):
                for dx in (-1, 0, 1):
                    if dy == 0 and dx == 0:
                        continue
                    t = (dy + 1) * 3 + (dx + 1)
                    d = dy * W + dx               # flat source offset
                    # want v[p] = h1[p + d]  ->  roll by -d (mod HW)
                    v = pltpu.roll(h1, shift=(-d) % HW, axis=1)
                    acc = acc + (v * masks[t:t + 1, :]) * wd[:, t:t + 1]
            acc = acc + bd

            # ---- 1x1 conv (BN folded) + ReLU ----
            h3 = jnp.dot(w3, acc, preferred_element_type=jnp.float32)
            h3 = jnp.maximum(h3 + b3, 0.0)

            # ---- fused concat + channel_shuffle(groups=2) ----
            #   out channel 2c   = x1[c] -> lanes [0, HW)
            #   out channel 2c+1 = y2[c] -> lanes [HW, 2*HW)
            # Both slices are 128-lane aligned -> unmasked stores.
            o_ref[n, :, :HW] = x_ref[n, :Cb, :].astype(o_ref.dtype)
            o_ref[n, :, HW:] = h3.astype(o_ref.dtype)

    return kernel


def make_dw_masks(H, W):
    """(9, H*W) float32 masks: 1.0 where source pixel (h+dy, w+dx) is in-image."""
    HW = H * W
    p = np.arange(HW)
    h = p // W
    w = p % W
    masks = np.zeros((9, HW), np.float32)
    for dy in (-1, 0, 1):
        for dx in (-1, 0, 1):
            t = (dy + 1) * 3 + (dx + 1)
            ok = (h + dy >= 0) & (h + dy <= H - 1) & (w + dx >= 0) & (w + dx <= W - 1)
            masks[t] = ok.astype(np.float32)
    return jnp.asarray(masks)


def shuffle_unit_forward(x_nchw, params):
    """ShuffleUnit forward, stride=1 path (in_channels == out_channels)."""
    # TODO(synk): stride>1 path (branch1 + strided branch2) not implemented here.
    w1t, b1, wd, bd, w3t, b3 = params
    N, Cin, H, W = x_nchw.shape
    assert Cin % 2 == 0, "stride=1 ShuffleUnit needs an even channel count"
    Cb = Cin // 2
    HW = H * W
    assert HW % 128 == 0, "H*W must be a multiple of 128 for lane-aligned stores"

    # One packed const block for all six small operands (one DMA descriptor).
    wpack = jnp.concatenate([w1t, w3t, wd, b1, bd, b3], axis=1)   # (Cb, 2Cb+12)
    masks = make_dw_masks(H, W)                                   # (9, HW)
    x_flat = x_nchw.reshape(N, Cin, HW)                           # free reshape

    out = pl.pallas_call(
        _make_shuffle_unit_kernel(N, Cb, H, W),
        out_shape=jax.ShapeDtypeStruct((N, Cb, 2 * HW), x_nchw.dtype),
        grid_spec=pltpu.PrefetchScalarGridSpec(
            num_scalar_prefetch=0,
            grid=(1,),  # whole batch in one step: no per-image grid overhead
            in_specs=[
                pl.BlockSpec((N, Cin, HW), lambda i: (0, 0, 0)),       # x (both halves)
                pl.BlockSpec((Cb, 2 * Cb + 12), lambda i: (0, 0)),     # packed params
                pl.BlockSpec((9, HW), lambda i: (0, 0)),               # dw masks
            ],
            out_specs=pl.BlockSpec((N, Cb, 2 * HW), lambda i: (0, 0, 0)),
        ),
        # Single grid step: megacore split is not worth it at this size.
        compiler_params=pltpu.CompilerParams(
            dimension_semantics=("arbitrary",)),
    )(x_flat, wpack, masks)

    # groups=2 channel shuffle already done by the (c, g) lane interleave:
    # (N, Cb, 2*HW) -> (N, 2*Cb, H, W) is a pure reshape (no data movement).
    return out.reshape(N, 2 * Cb, H, W)


# ------------------------- deterministic params -------------------------

def init_params(key, Cb, eps=1e-5):
    keys = jax.random.split(key, 6)
    w1_raw = jax.random.normal(keys[0], (Cb, Cb), jnp.float32) * 0.3   # (in, out)
    wd_raw = jax.random.normal(keys[1], (3, 3, Cb), jnp.float32) * 0.3
    w3_raw = jax.random.normal(keys[2], (Cb, Cb), jnp.float32) * 0.3

    def bn(k):
        k1, k2, k3, k4 = jax.random.split(k, 4)
        gamma = 1.0 + 0.1 * jax.random.normal(k1, (Cb,), jnp.float32)
        beta = 0.1 * jax.random.normal(k2, (Cb,), jnp.float32)
        mean = 0.1 * jax.random.normal(k3, (Cb,), jnp.float32)
        var = 0.5 + jnp.abs(jax.random.normal(k4, (Cb,), jnp.float32))
        return gamma, beta, mean, var

    g1, be1, m1, v1 = bn(keys[3])
    gd, bed, md, vd = bn(keys[4])
    g3, be3, m3, v3 = bn(keys[5])

    s1 = g1 / jnp.sqrt(v1 + eps)
    sd = gd / jnp.sqrt(vd + eps)
    s3 = g3 / jnp.sqrt(v3 + eps)

    # channel-major (Cout, Cin) layouts with BN folded
    w1t = w1_raw.T * s1[:, None]                          # (Cout, Cin)
    b1 = (be1 - m1 * s1)[:, None]                         # (Cb, 1)
    wd = (wd_raw * sd[None, None, :]).reshape(9, Cb).T    # (Cb, 9), t=(dy+1)*3+(dx+1)
    bd = (bed - md * sd)[:, None]
    w3t = w3_raw.T * s3[:, None]
    b3 = (be3 - m3 * s3)[:, None]
    return (w1t, b1, wd, bd, w3t, b3)


# ------------------------- pure-JAX reference -------------------------

def channel_shuffle(x_nchw, groups):
    N, Cn, H, W = x_nchw.shape
    cpg = Cn // groups
    x = x_nchw.reshape(N, groups, cpg, H, W)
    x = jnp.transpose(x, (0, 2, 1, 3, 4))
    return x.reshape(N, Cn, H, W)


def reference_forward(x_nchw, params):
    w1t, b1, wd, bd, w3t, b3 = params
    N, Cin, H, W = x_nchw.shape
    Cb = Cin // 2
    x1 = x_nchw[:, :Cb]
    x2 = jnp.transpose(x_nchw[:, Cb:], (0, 2, 3, 1))      # NHWC
    dn = ('NHWC', 'HWIO', 'NHWC')

    w1_hwio = jnp.transpose(w1t).reshape(1, 1, Cb, Cb)    # [1,1,I,O]
    wd_hwio = jnp.transpose(wd).reshape(3, 3, 1, Cb)      # [kh,kw,1,C]
    w3_hwio = jnp.transpose(w3t).reshape(1, 1, Cb, Cb)

    h = lax.conv_general_dilated(x2, w1_hwio, (1, 1), 'VALID',
                                 dimension_numbers=dn) + b1.reshape(1, 1, 1, Cb)
    h = jnp.maximum(h, 0.0)
    h = lax.conv_general_dilated(h, wd_hwio, (1, 1), [(1, 1), (1, 1)],
                                 dimension_numbers=dn,
                                 feature_group_count=Cb) + bd.reshape(1, 1, 1, Cb)
    h = lax.conv_general_dilated(h, w3_hwio, (1, 1), 'VALID',
                                 dimension_numbers=dn) + b3.reshape(1, 1, 1, Cb)
    h = jnp.maximum(h, 0.0)
    y2 = jnp.transpose(h, (0, 3, 1, 2))
    out = jnp.concatenate([x1, y2], axis=1)
    return channel_shuffle(out, 2)


if __name__ == "__main__":
    key = jax.random.PRNGKey(0)
    N, Cin, H, W = 2, 16, 16, 16   # stride=1: in_channels == out_channels
    Cb = Cin // 2
    kx, kp = jax.random.split(key)
    x = jax.random.normal(kx, (N, Cin, H, W), jnp.float32)
    params = init_params(kp, Cb)

    out = shuffle_unit_forward(x, params)
    out = jax.block_until_ready(out)

    ref = reference_forward(x, params)
    np.testing.assert_allclose(np.asarray(out), np.asarray(ref),
                               atol=1e-4, rtol=1e-4)
    print("KERNEL_OK")
</pallas_src>

<mosaic_0001>
module attributes {stable_mosaic.version = 11 : i64} {
  func.func @kernel(%arg0: i32, %arg1: memref<2x16x256xf32, #tpu.memory_space<vmem>>, %arg2: memref<8x28xf32, #tpu.memory_space<vmem>>, %arg3: memref<9x256xf32, #tpu.memory_space<vmem>>, %arg4: memref<2x8x512xf32, #tpu.memory_space<vmem>>) attributes {dimension_semantics = [#tpu.dimension_semantics<arbitrary>], iteration_bounds = array<i64: 1>, scalar_prefetch = 0 : i64, scratch_operands = 0 : i64, tpu.core_type = #tpu.core_type<tc>, window_params = [{pipeline_mode = #tpu.pipeline_mode<synchronous>, transform_indices = @transform_0, window_bounds = array<i64: 2, 16, 256>}, {pipeline_mode = #tpu.pipeline_mode<synchronous>, transform_indices = @transform_1, window_bounds = array<i64: 8, 28>}, {pipeline_mode = #tpu.pipeline_mode<synchronous>, transform_indices = @transform_2, window_bounds = array<i64: 9, 256>}, {pipeline_mode = #tpu.pipeline_mode<synchronous>, transform_indices = @transform_3, window_bounds = array<i64: 2, 8, 512>}]} {
    %c0 = arith.constant 0 : index
    %c0_0 = arith.constant 0 : index
    %0 = vector.load %arg2[%c0, %c0_0] : memref<8x28xf32, #tpu.memory_space<vmem>>, vector<8x28xf32>
    %1 = vector.extract_strided_slice %0 {offsets = [0, 0], sizes = [8, 8], strides = [1, 1]} : vector<8x28xf32> to vector<8x8xf32>
    %2 = vector.extract_strided_slice %0 {offsets = [0, 8], sizes = [8, 8], strides = [1, 1]} : vector<8x28xf32> to vector<8x8xf32>
    %3 = vector.extract_strided_slice %0 {offsets = [0, 16], sizes = [8, 9], strides = [1, 1]} : vector<8x28xf32> to vector<8x9xf32>
    %4 = vector.extract_strided_slice %0 {offsets = [0, 25], sizes = [8, 1], strides = [1, 1]} : vector<8x28xf32> to vector<8x1xf32>
    %5 = vector.extract_strided_slice %0 {offsets = [0, 26], sizes = [8, 1], strides = [1, 1]} : vector<8x28xf32> to vector<8x1xf32>
    %6 = vector.extract_strided_slice %0 {offsets = [0, 27], sizes = [8, 1], strides = [1, 1]} : vector<8x28xf32> to vector<8x1xf32>
    %c0_1 = arith.constant 0 : index
    %c0_2 = arith.constant 0 : index
    %7 = vector.load %arg3[%c0_1, %c0_2] : memref<9x256xf32, #tpu.memory_space<vmem>>, vector<9x256xf32>
    %c0_3 = arith.constant 0 : index
    %c8 = arith.constant 8 : index
    %c0_4 = arith.constant 0 : index
    %8 = vector.load %arg1[%c0_3, %c8, %c0_4] : memref<2x16x256xf32, #tpu.memory_space<vmem>>, vector<1x8x256xf32>
    %9 = vector.shape_cast %8 : vector<1x8x256xf32> to vector<8x256xf32>
    %cst = arith.constant dense<0.000000e+00> : vector<8x256xf32>
    %10 = tpu.matmul %1, %9, %cst {dimension_numbers = #tpu.dot_dimension_numbers<[1], [0], [0], [1], [0, 0, 1, 1], [], []>} : vector<8x8xf32>, vector<8x256xf32>, vector<8x256xf32> -> vector<8x256xf32>
    %11 = vector.broadcast %4 : vector<8x1xf32> to vector<8x256xf32>
    %12 = arith.addf %10, %11 : vector<8x256xf32>
    %cst_5 = arith.constant 0.000000e+00 : f32
    %13 = vector.broadcast %cst_5 : f32 to vector<8x256xf32>
    %14 = arith.maximumf %12, %13 : vector<8x256xf32>
    %15 = vector.extract_strided_slice %3 {offsets = [0, 4], sizes = [8, 1], strides = [1, 1]} : vector<8x9xf32> to vector<8x1xf32>
    %16 = vector.broadcast %15 : vector<8x1xf32> to vector<8x256xf32>
    %17 = arith.mulf %14, %16 : vector<8x256xf32>
    %c17_i32 = arith.constant 17 : i32
    %18 = tpu.dynamic_rotate %14 by %c17_i32 dim 1 : vector<8x256xf32>, i32 -> vector<8x256xf32>
    %19 = vector.extract_strided_slice %7 {offsets = [0, 0], sizes = [1, 256], strides = [1, 1]} : vector<9x256xf32> to vector<1x256xf32>
    %20 = vector.broadcast %19 : vector<1x256xf32> to vector<8x256xf32>
    %21 = arith.mulf %18, %20 : vector<8x256xf32>
    %22 = vector.extract_strided_slice %3 {offsets = [0, 0], sizes = [8, 1], strides = [1, 1]} : vector<8x9xf32> to vector<8x1xf32>
    %23 = vector.broadcast %22 : vector<8x1xf32> to vector<8x256xf32>
    %24 = arith.mulf %21, %23 : vector<8x256xf32>
    %25 = arith.addf %17, %24 : vector<8x256xf32>
    %c16_i32 = arith.constant 16 : i32
    %26 = tpu.dynamic_rotate %14 by %c16_i32 dim 1 : vector<8x256xf32>, i32 -> vector<8x256xf32>
    %27 = vector.extract_strided_slice %7 {offsets = [1, 0], sizes = [1, 256], strides = [1, 1]} : vector<9x256xf32> to vector<1x256xf32>
    %28 = vector.broadcast %27 : vector<1x256xf32> to vector<8x256xf32>
    %29 = arith.mulf %26, %28 : vector<8x256xf32>
    %30 = vector.extract_strided_slice %3 {offsets = [0, 1], sizes = [8, 1], strides = [1, 1]} : vector<8x9xf32> to vector<8x1xf32>
    %31 = vector.broadcast %30 : vector<8x1xf32> to vector<8x256xf32>
    %32 = arith.mulf %29, %31 : vector<8x256xf32>
    %33 = arith.addf %25, %32 : vector<8x256xf32>
    %c15_i32 = arith.constant 15 : i32
    %34 = tpu.dynamic_rotate %14 by %c15_i32 dim 1 : vector<8x256xf32>, i32 -> vector<8x256xf32>
    %35 = vector.extract_strided_slice %7 {offsets = [2, 0], sizes = [1, 256], strides = [1, 1]} : vector<9x256xf32> to vector<1x256xf32>
    %36 = vector.broadcast %35 : vector<1x256xf32> to vector<8x256xf32>
    %37 = arith.mulf %34, %36 : vector<8x256xf32>
    %38 = vector.extract_strided_slice %3 {offsets = [0, 2], sizes = [8, 1], strides = [1, 1]} : vector<8x9xf32> to vector<8x1xf32>
    %39 = vector.broadcast %38 : vector<8x1xf32> to vector<8x256xf32>
    %40 = arith.mulf %37, %39 : vector<8x256xf32>
    %41 = arith.addf %33, %40 : vector<8x256xf32>
    %c1_i32 = arith.constant 1 : i32
    %42 = tpu.dynamic_rotate %14 by %c1_i32 dim 1 : vector<8x256xf32>, i32 -> vector<8x256xf32>
    %43 = vector.extract_strided_slice %7 {offsets = [3, 0], sizes = [1, 256], strides = [1, 1]} : vector<9x256xf32> to vector<1x256xf32>
    %44 = vector.broadcast %43 : vector<1x256xf32> to vector<8x256xf32>
    %45 = arith.mulf %42, %44 : vector<8x256xf32>
    %46 = vector.extract_strided_slice %3 {offsets = [0, 3], sizes = [8, 1], strides = [1, 1]} : vector<8x9xf32> to vector<8x1xf32>
    %47 = vector.broadcast %46 : vector<8x1xf32> to vector<8x256xf32>
    %48 = arith.mulf %45, %47 : vector<8x256xf32>
    %49 = arith.addf %41, %48 : vector<8x256xf32>
    %c255_i32 = arith.constant 255 : i32
    %50 = tpu.dynamic_rotate %14 by %c255_i32 dim 1 : vector<8x256xf32>, i32 -> vector<8x256xf32>
    %51 = vector.extract_strided_slice %7 {offsets = [5, 0], sizes = [1, 256], strides = [1, 1]} : vector<9x256xf32> to vector<1x256xf32>
    %52 = vector.broadcast %51 : vector<1x256xf32> to vector<8x256xf32>
    %53 = arith.mulf %50, %52 : vector<8x256xf32>
    %54 = vector.extract_strided_slice %3 {offsets = [0, 5], sizes = [8, 1], strides = [1, 1]} : vector<8x9xf32> to vector<8x1xf32>
    %55 = vector.broadcast %54 : vector<8x1xf32> to vector<8x256xf32>
    %56 = arith.mulf %53, %55 : vector<8x256xf32>
    %57 = arith.addf %49, %56 : vector<8x256xf32>
    %c241_i32 = arith.constant 241 : i32
    %58 = tpu.dynamic_rotate %14 by %c241_i32 dim 1 : vector<8x256xf32>, i32 -> vector<8x256xf32>
    %59 = vector.extract_strided_slice %7 {offsets = [6, 0], sizes = [1, 256], strides = [1, 1]} : vector<9x256xf32> to vector<1x256xf32>
    %60 = vector.broadcast %59 : vector<1x256xf32> to vector<8x256xf32>
    %61 = arith.mulf %58, %60 : vector<8x256xf32>
    %62 = vector.extract_strided_slice %3 {offsets = [0, 6], sizes = [8, 1], strides = [1, 1]} : vector<8x9xf32> to vector<8x1xf32>
    %63 = vector.broadcast %62 : vector<8x1xf32> to vector<8x256xf32>
    %64 = arith.mulf %61, %63 : vector<8x256xf32>
    %65 = arith.addf %57, %64 : vector<8x256xf32>
    %c240_i32 = arith.constant 240 : i32
    %66 = tpu.dynamic_rotate %14 by %c240_i32 dim 1 : vector<8x256xf32>, i32 -> vector<8x256xf32>
    %67 = vector.extract_strided_slice %7 {offsets = [7, 0], sizes = [1, 256], strides = [1, 1]} : vector<9x256xf32> to vector<1x256xf32>
    %68 = vector.broadcast %67 : vector<1x256xf32> to vector<8x256xf32>
    %69 = arith.mulf %66, %68 : vector<8x256xf32>
    %70 = vector.extract_strided_slice %3 {offsets = [0, 7], sizes = [8, 1], strides = [1, 1]} : vector<8x9xf32> to vector<8x1xf32>
    %71 = vector.broadcast %70 : vector<8x1xf32> to vector<8x256xf32>
    %72 = arith.mulf %69, %71 : vector<8x256xf32>
    %73 = arith.addf %65, %72 : vector<8x256xf32>
    %c239_i32 = arith.constant 239 : i32
    %74 = tpu.dynamic_rotate %14 by %c239_i32 dim 1 : vector<8x256xf32>, i32 -> vector<8x256xf32>
    %75 = vector.extract_strided_slice %7 {offsets = [8, 0], sizes = [1, 256], strides = [1, 1]} : vector<9x256xf32> to vector<1x256xf32>
    %76 = vector.broadcast %75 : vector<1x256xf32> to vector<8x256xf32>
    %77 = arith.mulf %74, %76 : vector<8x256xf32>
    %78 = vector.extract_strided_slice %3 {offsets = [0, 8], sizes = [8, 1], strides = [1, 1]} : vector<8x9xf32> to vector<8x1xf32>
    %79 = vector.broadcast %78 : vector<8x1xf32> to vector<8x256xf32>
    %80 = arith.mulf %77, %79 : vector<8x256xf32>
    %81 = arith.addf %73, %80 : vector<8x256xf32>
    %82 = vector.broadcast %5 : vector<8x1xf32> to vector<8x256xf32>
    %83 = arith.addf %81, %82 : vector<8x256xf32>
    %cst_6 = arith.constant dense<0.000000e+00> : vector<8x256xf32>
    %84 = tpu.matmul %2, %83, %cst_6 {dimension_numbers = #tpu.dot_dimension_numbers<[1], [0], [0], [1], [0, 0, 1, 1], [], []>} : vector<8x8xf32>, vector<8x256xf32>, vector<8x256xf32> -> vector<8x256xf32>
    %85 = vector.broadcast %6 : vector<8x1xf32> to vector<8x256xf32>
    %86 = arith.addf %84, %85 : vector<8x256xf32>
    %cst_7 = arith.constant 0.000000e+00 : f32
    %87 = vector.broadcast %cst_7 : f32 to vector<8x256xf32>
    %88 = arith.maximumf %86, %87 : vector<8x256xf32>
    %c0_8 = arith.constant 0 : index
    %c0_9 = arith.constant 0 : index
    %c0_10 = arith.constant 0 : index
    %89 = vector.load %arg1[%c0_8, %c0_9, %c0_10] : memref<2x16x256xf32, #tpu.memory_space<vmem>>, vector<1x8x256xf32>
    %90 = vector.shape_cast %89 : vector<1x8x256xf32> to vector<8x256xf32>
    %c0_11 = arith.constant 0 : index
    %c0_12 = arith.constant 0 : index
    %c0_13 = arith.constant 0 : index
    %91 = vector.load %arg4[%c0_11, %c0_12, %c0_13] : memref<2x8x512xf32, #tpu.memory_space<vmem>>, vector<1x8x256xf32>
    %92 = vector.shape_cast %91 : vector<1x8x256xf32> to vector<8x256xf32>
    %93 = vector.shape_cast %90 : vector<8x256xf32> to vector<1x8x256xf32>
    tpu.vector_store %arg4[%c0_11, %c0_12, %c0_13], %93 {strides = array<i32>} : memref<2x8x512xf32, #tpu.memory_space<vmem>>, vector<1x8x256xf32>,
    %c0_14 = arith.constant 0 : index
    %c0_15 = arith.constant 0 : index
    %c256 = arith.constant 256 : index
    %94 = vector.load %arg4[%c0_14, %c0_15, %c256] : memref<2x8x512xf32, #tpu.memory_space<vmem>>, vector<1x8x256xf32>
    %95 = vector.shape_cast %94 : vector<1x8x256xf32> to vector<8x256xf32>
    %96 = vector.shape_cast %88 : vector<8x256xf32> to vector<1x8x256xf32>
    tpu.vector_store %arg4[%c0_14, %c0_15, %c256], %96 {strides = array<i32>} : memref<2x8x512xf32, #tpu.memory_space<vmem>>, vector<1x8x256xf32>,
    %c1 = arith.constant 1 : index
    %c8_16 = arith.constant 8 : index
    %c0_17 = arith.constant 0 : index
    %97 = vector.load %arg1[%c1, %c8_16, %c0_17] : memref<2x16x256xf32, #tpu.memory_space<vmem>>, vector<1x8x256xf32>
    %98 = vector.shape_cast %97 : vector<1x8x256xf32> to vector<8x256xf32>
    %cst_18 = arith.constant dense<0.000000e+00> : vector<8x256xf32>
    %99 = tpu.matmul %1, %98, %cst_18 {dimension_numbers = #tpu.dot_dimension_numbers<[1], [0], [0], [1], [0, 0, 1, 1], [], []>} : vector<8x8xf32>, vector<8x256xf32>, vector<8x256xf32> -> vector<8x256xf32>
    %100 = vector.broadcast %4 : vector<8x1xf32> to vector<8x256xf32>
    %101 = arith.addf %99, %100 : vector<8x256xf32>
    %cst_19 = arith.constant 0.000000e+00 : f32
    %102 = vector.broadcast %cst_19 : f32 to vector<8x256xf32>
    %103 = arith.maximumf %101, %102 : vector<8x256xf32>
    %104 = vector.extract_strided_slice %3 {offsets = [0, 4], sizes = [8, 1], strides = [1, 1]} : vector<8x9xf32> to vector<8x1xf32>
    %105 = vector.broadcast %104 : vector<8x1xf32> to vector<8x256xf32>
    %106 = arith.mulf %103, %105 : vector<8x256xf32>
    %c17_i32_20 = arith.constant 17 : i32
    %107 = tpu.dynamic_rotate %103 by %c17_i32_20 dim 1 : vector<8x256xf32>, i32 -> vector<8x256xf32>
    %108 = vector.extract_strided_slice %7 {offsets = [0, 0], sizes = [1, 256], strides = [1, 1]} : vector<9x256xf32> to vector<1x256xf32>
    %109 = vector.broadcast %108 : vector<1x256xf32> to vector<8x256xf32>
    %110 = arith.mulf %107, %109 : vector<8x256xf32>
    %111 = vector.extract_strided_slice %3 {offsets = [0, 0], sizes = [8, 1], strides = [1, 1]} : vector<8x9xf32> to vector<8x1xf32>
    %112 = vector.broadcast %111 : vector<8x1xf32> to vector<8x256xf32>
    %113 = arith.mulf %110, %112 : vector<8x256xf32>
    %114 = arith.addf %106, %113 : vector<8x256xf32>
    %c16_i32_21 = arith.constant 16 : i32
    %115 = tpu.dynamic_rotate %103 by %c16_i32_21 dim 1 : vector<8x256xf32>, i32 -> vector<8x256xf32>
    %116 = vector.extract_strided_slice %7 {offsets = [1, 0], sizes = [1, 256], strides = [1, 1]} : vector<9x256xf32> to vector<1x256xf32>
    %117 = vector.broadcast %116 : vector<1x256xf32> to vector<8x256xf32>
    %118 = arith.mulf %115, %117 : vector<8x256xf32>
    %119 = vector.extract_strided_slice %3 {offsets = [0, 1], sizes = [8, 1], strides = [1, 1]} : vector<8x9xf32> to vector<8x1xf32>
    %120 = vector.broadcast %119 : vector<8x1xf32> to vector<8x256xf32>
    %121 = arith.mulf %118, %120 : vector<8x256xf32>
    %122 = arith.addf %114, %121 : vector<8x256xf32>
    %c15_i32_22 = arith.constant 15 : i32
    %123 = tpu.dynamic_rotate %103 by %c15_i32_22 dim 1 : vector<8x256xf32>, i32 -> vector<8x256xf32>
    %124 = vector.extract_strided_slice %7 {offsets = [2, 0], sizes = [1, 256], strides = [1, 1]} : vector<9x256xf32> to vector<1x256xf32>
    %125 = vector.broadcast %124 : vector<1x256xf32> to vector<8x256xf32>
    %126 = arith.mulf %123, %125 : vector<8x256xf32>
    %127 = vector.extract_strided_slice %3 {offsets = [0, 2], sizes = [8, 1], strides = [1, 1]} : vector<8x9xf32> to vector<8x1xf32>
    %128 = vector.broadcast %127 : vector<8x1xf32> to vector<8x256xf32>
    %129 = arith.mulf %126, %128 : vector<8x256xf32>
    %130 = arith.addf %122, %129 : vector<8x256xf32>
    %c1_i32_23 = arith.constant 1 : i32
    %131 = tpu.dynamic_rotate %103 by %c1_i32_23 dim 1 : vector<8x256xf32>, i32 -> vector<8x256xf32>
    %132 = vector.extract_strided_slice %7 {offsets = [3, 0], sizes = [1, 256], strides = [1, 1]} : vector<9x256xf32> to vector<1x256xf32>
    %133 = vector.broadcast %132 : vector<1x256xf32> to vector<8x256xf32>
    %134 = arith.mulf %131, %133 : vector<8x256xf32>
    %135 = vector.extract_strided_slice %3 {offsets = [0, 3], sizes = [8, 1], strides = [1, 1]} : vector<8x9xf32> to vector<8x1xf32>
    %136 = vector.broadcast %135 : vector<8x1xf32> to vector<8x256xf32>
    %137 = arith.mulf %134, %136 : vector<8x256xf32>
    %138 = arith.addf %130, %137 : vector<8x256xf32>
    %c255_i32_24 = arith.constant 255 : i32
    %139 = tpu.dynamic_rotate %103 by %c255_i32_24 dim 1 : vector<8x256xf32>, i32 -> vector<8x256xf32>
    %140 = vector.extract_strided_slice %7 {offsets = [5, 0], sizes = [1, 256], strides = [1, 1]} : vector<9x256xf32> to vector<1x256xf32>
    %141 = vector.broadcast %140 : vector<1x256xf32> to vector<8x256xf32>
    %142 = arith.mulf %139, %141 : vector<8x256xf32>
    %143 = vector.extract_strided_slice %3 {offsets = [0, 5], sizes = [8, 1], strides = [1, 1]} : vector<8x9xf32> to vector<8x1xf32>
    %144 = vector.broadcast %143 : vector<8x1xf32> to vector<8x256xf32>
    %145 = arith.mulf %142, %144 : vector<8x256xf32>
    %146 = arith.addf %138, %145 : vector<8x256xf32>
    %c241_i32_25 = arith.constant 241 : i32
    %147 = tpu.dynamic_rotate %103 by %c241_i32_25 dim 1 : vector<8x256xf32>, i32 -> vector<8x256xf32>
    %148 = vector.extract_strided_slice %7 {offsets = [6, 0], sizes = [1, 256], strides = [1, 1]} : vector<9x256xf32> to vector<1x256xf32>
    %149 = vector.broadcast %148 : vector<1x256xf32> to vector<8x256xf32>
    %150 = arith.mulf %147, %149 : vector<8x256xf32>
    %151 = vector.extract_strided_slice %3 {offsets = [0, 6], sizes = [8, 1], strides = [1, 1]} : vector<8x9xf32> to vector<8x1xf32>
    %152 = vector.broadcast %151 : vector<8x1xf32> to vector<8x256xf32>
    %153 = arith.mulf %150, %152 : vector<8x256xf32>
    %154 = arith.addf %146, %153 : vector<8x256xf32>
    %c240_i32_26 = arith.constant 240 : i32
    %155 = tpu.dynamic_rotate %103 by %c240_i32_26 dim 1 : vector<8x256xf32>, i32 -> vector<8x256xf32>
    %156 = vector.extract_strided_slice %7 {offsets = [7, 0], sizes = [1, 256], strides = [1, 1]} : vector<9x256xf32> to vector<1x256xf32>
    %157 = vector.broadcast %156 : vector<1x256xf32> to vector<8x256xf32>
    %158 = arith.mulf %155, %157 : vector<8x256xf32>
    %159 = vector.extract_strided_slice %3 {offsets = [0, 7], sizes = [8, 1], strides = [1, 1]} : vector<8x9xf32> to vector<8x1xf32>
    %160 = vector.broadcast %159 : vector<8x1xf32> to vector<8x256xf32>
    %161 = arith.mulf %158, %160 : vector<8x256xf32>
    %162 = arith.addf %154, %161 : vector<8x256xf32>
    %c239_i32_27 = arith.constant 239 : i32
    %163 = tpu.dynamic_rotate %103 by %c239_i32_27 dim 1 : vector<8x256xf32>, i32 -> vector<8x256xf32>
    %164 = vector.extract_strided_slice %7 {offsets = [8, 0], sizes = [1, 256], strides = [1, 1]} : vector<9x256xf32> to vector<1x256xf32>
    %165 = vector.broadcast %164 : vector<1x256xf32> to vector<8x256xf32>
    %166 = arith.mulf %163, %165 : vector<8x256xf32>
    %167 = vector.extract_strided_slice %3 {offsets = [0, 8], sizes = [8, 1], strides = [1, 1]} : vector<8x9xf32> to vector<8x1xf32>
    %168 = vector.broadcast %167 : vector<8x1xf32> to vector<8x256xf32>
    %169 = arith.mulf %166, %168 : vector<8x256xf32>
    %170 = arith.addf %162, %169 : vector<8x256xf32>
    %171 = vector.broadcast %5 : vector<8x1xf32> to vector<8x256xf32>
    %172 = arith.addf %170, %171 : vector<8x256xf32>
    %cst_28 = arith.constant dense<0.000000e+00> : vector<8x256xf32>
    %173 = tpu.matmul %2, %172, %cst_28 {dimension_numbers = #tpu.dot_dimension_numbers<[1], [0], [0], [1], [0, 0, 1, 1], [], []>} : vector<8x8xf32>, vector<8x256xf32>, vector<8x256xf32> -> vector<8x256xf32>
    %174 = vector.broadcast %6 : vector<8x1xf32> to vector<8x256xf32>
    %175 = arith.addf %173, %174 : vector<8x256xf32>
    %cst_29 = arith.constant 0.000000e+00 : f32
    %176 = vector.broadcast %cst_29 : f32 to vector<8x256xf32>
    %177 = arith.maximumf %175, %176 : vector<8x256xf32>
    %c1_30 = arith.constant 1 : index
    %c0_31 = arith.constant 0 : index
    %c0_32 = arith.constant 0 : index
    %178 = vector.load %arg1[%c1_30, %c0_31, %c0_32] : memref<2x16x256xf32, #tpu.memory_space<vmem>>, vector<1x8x256xf32>
    %179 = vector.shape_cast %178 : vector<1x8x256xf32> to vector<8x256xf32>
    %c1_33 = arith.constant 1 : index
    %c0_34 = arith.constant 0 : index
    %c0_35 = arith.constant 0 : index
    %180 = vector.load %arg4[%c1_33, %c0_34, %c0_35] : memref<2x8x512xf32, #tpu.memory_space<vmem>>, vector<1x8x256xf32>
    %181 = vector.shape_cast %180 : vector<1x8x256xf32> to vector<8x256xf32>
    %182 = vector.shape_cast %179 : vector<8x256xf32> to vector<1x8x256xf32>
    tpu.vector_store %arg4[%c1_33, %c0_34, %c0_35], %182 {strides = array<i32>} : memref<2x8x512xf32, #tpu.memory_space<vmem>>, vector<1x8x256xf32>,
    %c1_36 = arith.constant 1 : index
    %c0_37 = arith.constant 0 : index
    %c256_38 = arith.constant 256 : index
    %183 = vector.load %arg4[%c1_36, %c0_37, %c256_38] : memref<2x8x512xf32, #tpu.memory_space<vmem>>, vector<1x8x256xf32>
    %184 = vector.shape_cast %183 : vector<1x8x256xf32> to vector<8x256xf32>
    %185 = vector.shape_cast %177 : vector<8x256xf32> to vector<1x8x256xf32>
    tpu.vector_store %arg4[%c1_36, %c0_37, %c256_38], %185 {strides = array<i32>} : memref<2x8x512xf32, #tpu.memory_space<vmem>>, vector<1x8x256xf32>,
    return
  }
  func.func @transform_0(%arg0: i32) -> (i32, i32, i32) {
    %c0_i32 = arith.constant 0 : i32
    %c0_i32_0 = arith.constant 0 : i32
    %c0_i32_1 = arith.constant 0 : i32
    %c0_i32_2 = arith.constant 0 : i32
    return %c0_i32, %c0_i32_0, %c0_i32_1 : i32, i32, i32
  }
  func.func @transform_1(%arg0: i32) -> (i32, i32) {
    %c0_i32 = arith.constant 0 : i32
    %c0_i32_0 = arith.constant 0 : i32
    %c0_i32_1 = arith.constant 0 : i32
    return %c0_i32, %c0_i32_0 : i32, i32
  }
  func.func @transform_2(%arg0: i32) -> (i32, i32) {
    %c0_i32 = arith.constant 0 : i32
    %c0_i32_0 = arith.constant 0 : i32
    %c0_i32_1 = arith.constant 0 : i32
    return %c0_i32, %c0_i32_0 : i32, i32
  }
  func.func @transform_3(%arg0: i32) -> (i32, i32, i32) {
    %c0_i32 = arith.constant 0 : i32
    %c0_i32_0 = arith.constant 0 : i32
    %c0_i32_1 = arith.constant 0 : i32
    %c0_i32_2 = arith.constant 0 : i32
    return %c0_i32, %c0_i32_0, %c0_i32_1 : i32, i32, i32
  }
}

</mosaic_0001>

<bundles_post_ra>
// kernel: tpu_custom_call.1
= control target key start
LH: loop header
LB: loop body
LE: loop exit
PB: predicated region body
PF: predicated region fallthrough
CT: control target
= control target key end

     0   :  { %8 = vsyncpa [#allocation3], 0  ;;  %s1103_s0 = inlined_call_operand.hbm [shape: f32[2,16,256], index: 0, kind: input, shape index: {}]   ;;  %s1104_s1 = inlined_call_operand.hbm [shape: f32[8,28], index: 1, kind: input, shape index: {}]   ;;  %s1105_s2 = inlined_call_operand.hbm [shape: f32[9,256], index: 2, kind: input, shape index: {}]   ;;  %s1106_s3 = inlined_call_operand.hbm [shape: f32[2,8,512], index: 3, kind: output, shape index: {}]  }
   0x1   :  { %9 = vsyncpa [#allocation6], 0  ;;  %s29_s14 = sshll.u32 %s1104_s1, 4  ;;  %s30_s14 = int_to_ptr.hbm [resolvable:$true] %s29_s14 }
   0x2   :  { %10 = vsyncpa [#allocation4], 0  ;;  %s706_s15 = smov [#allocation5]   ;;  %s15_s19 = sshll.u32 %s1103_s0, 4  ;;  %s16_s19 = int_to_ptr.hbm [resolvable:$true] %s15_s19 }
   0x3   :  { %s31_s16 = sshll.u32 %s706_s15, 4  ;;  %s707_s20 = smov [#allocation2]   ;;  %s32_s16 = int_to_ptr.vmem [resolvable:$true] %s31_s16 }
   0x4   :  { %34 = dma.hbm_to_vmem [thread:$0]  %s30_s14, 128, %s32_s16, [#allocation6]  }
   0x5   :  { %s17_s21 = sshll.u32 %s707_s20, 4  ;;  %s708_s22 = smov 256   ;;  %s18_s21 = int_to_ptr.vmem [resolvable:$true] %s17_s21 }
   0x6   :  { %s709_s23 = smov 16   ;;  %s39_s25 = sshll.u32 %s1105_s2, 4  ;;  %s40_s25 = int_to_ptr.hbm [resolvable:$true] %s39_s25 }
   0x7   :  { %23 = dma.hbm_to_vmem [thread:$0]  %s16_s19, 1024, %s18_s21, [#allocation3], %s708_s22, %s708_s22, %s709_s23  }
   0x8   :  { %s710_s26 = smov [#allocation7]  }
   0x9   :  { %s41_s27 = sshll.u32 %s710_s26, 4  ;;  %s42_s27 = int_to_ptr.vmem [resolvable:$true] %s41_s27 }
   0xa   :  { %47 = dma.hbm_to_vmem [thread:$0]  %s40_s25, 512, %s42_s27, [#allocation6], %s708_s22, %s708_s22, %s709_s23  }
   0xb   :  { %700 = dma.done.wait [#allocation3], 1024  }
   0xc   :  { %701 = vsyncadd [#allocation3], 4294966272 }
   0xd   :  { %702 = dma.done.wait [#allocation6], 640  }
   0xe   :  { %703 = vsyncadd [#allocation6], 4294966656  ;;  %v711_v0 = vmov 25   ;;  %v712_v1 = vmov 20   ;;  %v713_v2 = vmov 17   ;;  %vm72_vm0 = vcmask 64512  }
   0xf   :  { %589 = vset.pattern.permute.xlu0 %v711_v0  ;;  %590 = vset.pattern.permute.xlu2 %v712_v1  ;;  %v65_v3 = vld [vmem:[#allocation2 + $0x10] sm:$0xff]  ;;  %v66_v4 = vld [vmem:[#allocation2 + $0x18] sm:$0xff]  ;;  %v765_v5 = vld [vmem:[#allocation5] sm:$0xff]  ;;  %v714_v8 = vmov 16   ;;  %v715_v9 = vmov 18   ;;  %v716_v10 = vmov 19   ;;  %v127_v43 = vlaneseq }
  0x10   :  { %592 = vset.pattern.permute.xlu1 %v713_v2  ;;  %90 = vmatpush.msra.mxu0 %v65_v3  ;;  %v340_v6 = vld [vmem:[#allocation2 + $0x30] sm:$0xff]  ;;  %v341_v7 = vld [vmem:[#allocation2 + $0x38] sm:$0xff]  ;;  %v717_v11 = vmov 24   ;;  %v718_v12 = vmov 21   ;;  %v719_v13 = vmov 22   ;;  %v720_v14 = vmov 23  }
  0x11   :  { %110 = vmatpush.msra.mxu1 %v66_v4  ;;  %553 = vmatmul.msk.f32.vlgmr.msra.gmra.mxu0 %vm72_vm0, %v765_v5  ;;  %s721_s0 = smov 17   ;;  %s722_s2 = smov 15   ;;  %v724_v22 = vmov 26   ;;  %v879_v47 = vand.u32 127, %v127_v43  ;;  %v881_v48 = vld [vmem:[#allocation7] sm:$0xff]  ;;  %v883_v49 = vld [vmem:[#allocation7 + $0x8] sm:$0xff] }
  0x12   :  { %554 = vmatmul.msk.f32.vlgmr.msra.gmra.mxu1 %vm72_vm0, %v765_v5  ;;  %357 = vmatpush.msrb.mxu0 %v340_v6  ;;  %s723_s28 = smov 1   ;;  %s725_s29 = smov 127   ;;  %v132_v50 = vperm.slane %v881_v48, 0  ;;  %v133_v51 = vperm.slane %v883_v49, 0  ;;  %v151_v57 = vperm.slane %v881_v48, 1  ;;  %v152_v58 = vperm.slane %v883_v49, 1 }
  0x13   :  { %377 = vmatpush.msrb.mxu1 %v341_v7  ;;  %69 = vperm.xlu0 %589, %v765_v5   ;;  %s726_s30 = smov 113   ;;  %s727_s4 = smov 112   ;;  %vm129_vm1 = vcmp.lt.s32.totalorder %v879_v47, 17  ;;  %vm148_vm2 = vcmp.lt.s32.totalorder %v879_v47, 16  ;;  %vm167_vm3 = vcmp.lt.s32.totalorder %v879_v47, 15  ;;  %v170_v63 = vperm.slane %v881_v48, 2 }
  0x14   :  { %118 = vperm.xlu2 %590, %v765_v5   ;;  %156 = vperm.xlu1 %592, %v765_v5   ;;  %s728_s5 = smov 111   ;;  %s729_s6 = smov 120   ;;  %v171_v0 = vperm.slane %v883_v49, 2  ;;  %vm186_vm4 = vcmp.lt.s32.totalorder %v879_v47, 1  ;;  %vm205_vm5 = vcmp.lt.s32.totalorder %v879_v47, 127  ;;  %vm224_vm6 = vcmp.lt.s32.totalorder %v879_v47, 113 }
  0x15   :  { %vm243_vm7 = vcmp.lt.s32.totalorder %v879_v47, 112  ;;  %vm262_vm8 = vcmp.lt.s32.totalorder %v879_v47, 111  ;;  %s731_s7 = smov [#allocation8]   ;;  %s539_s11 = sshll.u32 %s1106_s3, 4  ;;  %s540_s11 = int_to_ptr.hbm [resolvable:$true] %s539_s11 }
  0x16   :  { %s537_s8 = sshll.u32 %s731_s7, 4  ;;  %s732_s12 = smov 512   ;;  %s538_s8 = int_to_ptr.vmem [resolvable:$true] %s537_s8 }
  0x17   :  { %s733_s13 = smov 32  }
  0x19   :  { %557 = vmatmul.msk.f32.vlgmr.msrb.gmra.mxu0 %vm72_vm0, %v765_v5 }
  0x1a   :  { %558 = vmatmul.msk.f32.vlgmr.msrb.gmra.mxu1 %vm72_vm0, %v765_v5 }
  0x1b   :  { %591 = vset.pattern.permute.xlu0 %v714_v8 }
  0x1c   :  { %137 = vperm.xlu0 %591, %v765_v5   ;;  %593 = vset.pattern.permute.xlu1 %v715_v9 }
  0x1d   :  { %175 = vperm.xlu1 %593, %v765_v5  }
  0x24   :  { %594 = vset.pattern.permute.xlu0 %v716_v10 }
  0x25   :  { %194 = vperm.xlu0 %594, %v765_v5   ;;  %598 = vset.pattern.permute.xlu1 %v717_v11 }
  0x26   :  { %270 = vperm.xlu1 %598, %v765_v5  }
  0x2d   :  { %595 = vset.pattern.permute.xlu0 %v718_v12 }
  0x2e   :  { %213 = vperm.xlu0 %595, %v765_v5  }
  0x36   :  { %596 = vset.pattern.permute.xlu0 %v719_v13 }
  0x37   :  { %232 = vperm.xlu0 %596, %v765_v5  }
  0x3f   :  { %597 = vset.pattern.permute.xlu0 %v720_v14  ;;  %v189_v14 = vperm.slane %v881_v48, 3 }
  0x40   :  { %251 = vperm.xlu0 %597, %v765_v5  }
  0x48   :  { %599 = vset.pattern.permute.xlu0 %v724_v22 }
  0x6e   :  { %v850_v31 = vpop.permute.xlu2 %118 }
  0x85   :  { %v70_v15 = vpop.permute.xlu0 %69 }
  0x86   :  { %v852_v32 = vpop.permute.xlu1 %156 }
  0x8e   :  { %v92_v16 = vpop.f32.mrf.mxu0  ;;  %v838_v29 = vpop.permute.xlu0 %137 }
  0x8f   :  { %v112_v17 = vpop.f32.mrf.mxu1  ;;  %v93_v18 = vadd.f32 %v92_v16, %v70_v15  ;;  %v860_v35 = vpop.permute.xlu1 %175 }
  0x90   :  { %v113_v19 = vadd.f32 %v112_v17, %v70_v15 }
  0x91   :  { %v785_v20 = vmax.f32 %v93_v18, 0.0 }
  0x92   :  { %v787_v21 = vmax.f32 %v113_v19, 0.0 }
  0x93   :  { %123 = vrot.lane.b32.xlu0 %v785_v20, %s721_s0  ;;  %v121_v12 = vmul.f32 %v850_v31, %v785_v20 }
  0x94   :  { %146 = vrot.lane.b32.xlu2 %v787_v21, %s709_s23  ;;  %125 = vrot.lane.b32.xlu1 %v787_v21, %s721_s0  ;;  %v122_v13 = vmul.f32 %v850_v31, %v787_v21 }
  0x96   :  { %v359_v26 = vpop.f32.mrf.mxu0 }
  0x97   :  { %v379_v23 = vpop.f32.mrf.mxu1  ;;  %v360_v27 = vadd.f32 %v359_v26, %v70_v15  ;;  %v848_v30 = vpop.permute.xlu0 %194 }
  0x98   :  { %v380_v24 = vadd.f32 %v379_v23, %v70_v15  ;;  %v871_v38 = vpop.permute.xlu1 %270  ;;  %v190_v15 = vperm.slane %v883_v49, 3 }
  0x99   :  { %v824_v28 = vmax.f32 %v360_v27, 0.0 }
  0x9a   :  { %v807_v25 = vmax.f32 %v380_v24, 0.0 }
  0x9b   :  { %184 = vrot.lane.b32.xlu0 %v787_v21, %s723_s28 }
  0x9c   :  { %165 = vrot.lane.b32.xlu2 %v787_v21, %s722_s2  ;;  %144 = vrot.lane.b32.xlu1 %v785_v20, %s709_s23 }
  0xa0   :  { %v858_v34 = vpop.permute.xlu0 %213 }
  0xa3   :  { %203 = vrot.lane.b32.xlu0 %v787_v21, %s725_s29 }
  0xa4   :  { %182 = vrot.lane.b32.xlu2 %v785_v20, %s723_s28  ;;  %163 = vrot.lane.b32.xlu1 %v785_v20, %s722_s2 }
  0xa9   :  { %v866_v37 = vpop.permute.xlu0 %232 }
  0xab   :  { %448 = vrot.lane.b32.xlu0 %v807_v25, %s726_s30 }
  0xac   :  { %201 = vrot.lane.b32.xlu2 %v785_v20, %s725_s29  ;;  %220 = vrot.lane.b32.xlu1 %v785_v20, %s726_s30 }
  0xb2   :  { %v873_v40 = vpop.permute.xlu0 %251 }
  0xb3   :  { %278 = vperm.xlu0 %599, %v765_v5  }
  0xb4   :  { %222 = vrot.lane.b32.xlu2 %v787_v21, %s726_s30  ;;  %239 = vrot.lane.b32.xlu1 %v785_v20, %s727_s4 }
  0xbc   :  { %241 = vrot.lane.b32.xlu2 %v787_v21, %s727_s4  ;;  %258 = vrot.lane.b32.xlu1 %v785_v20, %s728_s5  ;;  %v208_v20 = vperm.slane %v881_v48, 5 }
  0xc4   :  { %260 = vrot.lane.b32.xlu2 %v787_v21, %s728_s5  ;;  %386 = vrot.lane.b32.xlu1 %v824_v28, %s721_s0 }
  0xcc   :  { %388 = vrot.lane.b32.xlu2 %v807_v25, %s721_s0  ;;  %398 = vrot.lane.b32.xlu1 %v824_v28, %s709_s23 }
  0xd4   :  { %400 = vrot.lane.b32.xlu2 %v807_v25, %s709_s23  ;;  %410 = vrot.lane.b32.xlu1 %v824_v28, %s722_s2 }
  0xdc   :  { %412 = vrot.lane.b32.xlu2 %v807_v25, %s722_s2  ;;  %422 = vrot.lane.b32.xlu1 %v824_v28, %s723_s28 }
  0xe4   :  { %424 = vrot.lane.b32.xlu2 %v807_v25, %s723_s28  ;;  %434 = vrot.lane.b32.xlu1 %v824_v28, %s725_s29 }
  0xec   :  { %436 = vrot.lane.b32.xlu2 %v807_v25, %s725_s29  ;;  %458 = vrot.lane.b32.xlu1 %v824_v28, %s727_s4 }
  0xee   :  { %v147_v33 = vpop.permute.xlu2 %146 }
  0xf4   :  { %446 = vrot.lane.b32.xlu2 %v824_v28, %s726_s30  ;;  %470 = vrot.lane.b32.xlu1 %v824_v28, %s728_s5 }
  0xf6   :  { %v166_v36 = vpop.permute.xlu2 %165 }
  0xfc   :  { %460 = vrot.lane.b32.xlu2 %v807_v25, %s727_s4  ;;  %287 = vrot.lane.b32.xlu1 %v765_v5, %s729_s6 }
  0xfe   :  { %v183_v39 = vpop.permute.xlu2 %182 }
 0x104   :  { %472 = vrot.lane.b32.xlu2 %v807_v25, %s728_s5 }
 0x105   :  { %v124_v44 = vpop.permute.xlu0 %123 }
 0x106   :  { %v126_v41 = vpop.permute.xlu1 %125  ;;  %v877_v42 = vpop.permute.xlu2 %201 }
 0x107   :  { %v130_v54 = vsel %vm129_vm1, %v124_v44, %v126_v41  ;;  %v131_v55 = vsel %vm129_vm1, %v126_v41, %v124_v44  ;;  %v228_v44 = vperm.slane %v883_v49, 6 }
 0x108   :  { %v134_v61 = vmul.f32 %v132_v50, %v131_v55  ;;  %v135_v62 = vmul.f32 %v133_v51, %v130_v54 }
 0x10a   :  { %v140_v6 = vmul.f32 %v838_v29, %v134_v61  ;;  %v141_v7 = vmul.f32 %v838_v29, %v135_v62  ;;  %v246_v61 = vperm.slane %v881_v48, 7  ;;  %v247_v62 = vperm.slane %v883_v49, 7 }
 0x10c   :  { %v142_v21 = vadd.f32 %v140_v6, %v121_v12  ;;  %v143_v23 = vadd.f32 %v141_v7, %v122_v13 }
 0x10d   :  { %v185_v56 = vpop.permute.xlu0 %184 }
 0x10e   :  { %v223_v45 = vpop.permute.xlu2 %222  ;;  %v145_v46 = vpop.permute.xlu1 %144  ;;  %v187_v18 = vsel %vm186_vm4, %v183_v39, %v185_v56  ;;  %v188_v19 = vsel %vm186_vm4, %v185_v56, %v183_v39  ;;  %v227_v39 = vperm.slane %v881_v48, 6 }
 0x10f   :  { %v149_v59 = vsel %vm148_vm2, %v145_v46, %v147_v33  ;;  %v150_v60 = vsel %vm148_vm2, %v147_v33, %v145_v46  ;;  %v191_v27 = vmul.f32 %v189_v14, %v188_v19  ;;  %v192_v33 = vmul.f32 %v190_v15, %v187_v18 }
 0x110   :  { %v153_v3 = vmul.f32 %v151_v57, %v150_v60  ;;  %v154_v4 = vmul.f32 %v152_v58, %v149_v59 }
 0x112   :  { %v159_v16 = vmul.f32 %v852_v32, %v153_v3  ;;  %v160_v17 = vmul.f32 %v852_v32, %v154_v4  ;;  %v198_v3 = vmul.f32 %v848_v30, %v192_v33 }
 0x114   :  { %v161_v41 = vadd.f32 %v159_v16, %v142_v21  ;;  %v162_v43 = vadd.f32 %v160_v17, %v143_v23  ;;  %v991_v21 = vld [vmem:[#allocation7 + $0x18] ss:$0 sm:$0xff] }
 0x115   :  { %v204_v22 = vpop.permute.xlu0 %203 }
 0x116   :  { %v889_v52 = vpop.permute.xlu2 %241  ;;  %v164_v53 = vpop.permute.xlu1 %163  ;;  %v206_v46 = vsel %vm205_vm5, %v877_v42, %v204_v22 }
 0x117   :  { %v168_v1 = vsel %vm167_vm3, %v164_v53, %v166_v36  ;;  %v169_v2 = vsel %vm167_vm3, %v166_v36, %v164_v53  ;;  %v209_v36 = vperm.slane %v883_v49, 5  ;;  %v207_v53 = vsel %vm205_vm5, %v204_v22, %v877_v42  ;;  %v989_v22 = vld [vmem:[#allocation7 + $0x10] ss:$0 sm:$0xff] }
 0x118   :  { %v172_v8 = vmul.f32 %v170_v63, %v169_v2  ;;  %v173_v9 = vmul.f32 %v171_v0, %v168_v1  ;;  %v197_v2 = vmul.f32 %v848_v30, %v191_v27  ;;  %v210_v4 = vmul.f32 %v208_v20, %v206_v46 }
 0x119   :  { %v211_v6 = vmul.f32 %v209_v36, %v207_v53 }
 0x11a   :  { %v178_v24 = vmul.f32 %v860_v35, %v172_v8  ;;  %v179_v26 = vmul.f32 %v860_v35, %v173_v9  ;;  %v216_v16 = vmul.f32 %v858_v34, %v210_v4 }
 0x11b   :  { %v217_v17 = vmul.f32 %v858_v34, %v211_v6 }
 0x11c   :  { %v180_v56 = vadd.f32 %v178_v24, %v161_v41  ;;  %v181_v59 = vadd.f32 %v179_v26, %v162_v43 }
 0x11d   :  { %v982_v13 = vpop.permute.xlu0 %448 }
 0x11e   :  { %v923_v10 = vpop.permute.xlu2 %260  ;;  %v221_v11 = vpop.permute.xlu1 %220  ;;  %v200_v9 = vadd.f32 %v198_v3, %v181_v59 }
 0x11f   :  { %v225_v54 = vsel %vm224_vm6, %v221_v11, %v223_v45  ;;  %v226_v55 = vsel %vm224_vm6, %v223_v45, %v221_v11  ;;  %v199_v11 = vadd.f32 %v197_v2, %v180_v56 }
 0x120   :  { %v229_v7 = vmul.f32 %v227_v39, %v225_v54  ;;  %v230_v8 = vmul.f32 %v228_v44, %v226_v55  ;;  %v219_v24 = vadd.f32 %v217_v17, %v200_v9 }
 0x121   :  { %v218_v23 = vadd.f32 %v216_v16, %v199_v11 }
 0x122   :  { %v235_v18 = vmul.f32 %v866_v37, %v229_v7  ;;  %v236_v19 = vmul.f32 %v866_v37, %v230_v8 }
 0x124   :  { %v237_v55 = vadd.f32 %v235_v18, %v218_v23  ;;  %v238_v56 = vadd.f32 %v236_v19, %v219_v24 }
 0x126   :  { %v389_v60 = vpop.permute.xlu2 %388  ;;  %v240_v1 = vpop.permute.xlu1 %239 }
 0x127   :  { %v244_v42 = vsel %vm243_vm7, %v240_v1, %v889_v52  ;;  %v245_v45 = vsel %vm243_vm7, %v889_v52, %v240_v1 }
 0x128   :  { %v248_v12 = vmul.f32 %v246_v61, %v244_v42  ;;  %v249_v52 = vmul.f32 %v247_v62, %v245_v45  ;;  %v1005_v42 = vpop.permute.xlu0 %278 }
 0x12a   :  { %v254_v26 = vmul.f32 %v873_v40, %v248_v12  ;;  %v255_v27 = vmul.f32 %v873_v40, %v249_v52 }
 0x12c   :  { %v256_v59 = vadd.f32 %v254_v26, %v237_v55  ;;  %v257_v2 = vadd.f32 %v255_v27, %v238_v56  ;;  %v730_v56 = vmov 27  }
 0x12d   :  { %600 = vset.pattern.permute.xlu2 %v730_v56  ;;  %601 = vset.pattern.permute.xlu0 %v730_v56 }
 0x12e   :  { %v401_v33 = vpop.permute.xlu2 %400  ;;  %v259_v41 = vpop.permute.xlu1 %258  ;;  %284 = vperm.xlu2 %600, %v765_v5  }
 0x12f   :  { %v263_v43 = vsel %vm262_vm8, %v259_v41, %v923_v10  ;;  %v264_v46 = vsel %vm262_vm8, %v923_v10, %v259_v41 }
 0x130   :  { %v267_v53 = vmul.f32 %v989_v22, %v263_v43  ;;  %v268_v54 = vmul.f32 %v991_v21, %v264_v46  ;;  %v384_v46 = vmul.f32 %v824_v28, %v850_v31 }
 0x132   :  { %v273_v1 = vmul.f32 %v871_v38, %v267_v53  ;;  %v274_v3 = vmul.f32 %v871_v38, %v268_v54  ;;  %v385_v54 = vmul.f32 %v807_v25, %v850_v31 }
 0x134   :  { %v275_v45 = vadd.f32 %v273_v1, %v256_v59  ;;  %v276_v4 = vadd.f32 %v274_v3, %v257_v2 }
 0x136   :  { %v413_v6 = vpop.permute.xlu2 %412  ;;  %v387_v7 = vpop.permute.xlu1 %386  ;;  %v281_v10 = vadd.f32 %v1005_v42, %v275_v45  ;;  %v282_v8 = vadd.f32 %v1005_v42, %v276_v4 }
 0x137   :  { %v391_v17 = vsel %vm129_vm1, %v389_v60, %v387_v7  ;;  %v390_v18 = vsel %vm129_vm1, %v387_v7, %v389_v60 }
 0x138   :  { %306 = vmatpush.msra.mxu2 %v281_v10  ;;  %326 = vmatpush.msra.mxu3 %v282_v8  ;;  %v392_v19 = vmul.f32 %v391_v17, %v132_v50  ;;  %v393_v27 = vmul.f32 %v390_v18, %v133_v51 }
 0x13a   :  { %v395_v51 = vmul.f32 %v393_v27, %v838_v29 }
 0x13e   :  { %v425_v9 = vpop.permute.xlu2 %424  ;;  %v399_v11 = vpop.permute.xlu1 %398 }
 0x13f   :  { %v402_v23 = vsel %vm148_vm2, %v399_v11, %v401_v33  ;;  %v403_v24 = vsel %vm148_vm2, %v401_v33, %v399_v11  ;;  %v394_v33 = vmul.f32 %v392_v19, %v838_v29 }
 0x140   :  { %v404_v41 = vmul.f32 %v403_v24, %v151_v57  ;;  %v405_v43 = vmul.f32 %v402_v23, %v152_v58 }
 0x142   :  { %v406_v29 = vmul.f32 %v404_v41, %v852_v32  ;;  %v407_v59 = vmul.f32 %v405_v43, %v852_v32 }
 0x146   :  { %v411_v12 = vpop.permute.xlu1 %410  ;;  %v437_v52 = vpop.permute.xlu2 %436 }
 0x147   :  { %v414_v60 = vsel %vm167_vm3, %v411_v12, %v413_v6  ;;  %v415_v50 = vsel %vm167_vm3, %v413_v6, %v411_v12 }
 0x148   :  { %v416_v55 = vmul.f32 %v415_v50, %v170_v63  ;;  %v417_v28 = vmul.f32 %v414_v60, %v171_v0  ;;  %v396_v63 = vadd.f32 %v394_v33, %v384_v46  ;;  %v397_v0 = vadd.f32 %v395_v51, %v385_v54 }
 0x14a   :  { %v418_v3 = vmul.f32 %v416_v55, %v860_v35  ;;  %v419_v32 = vmul.f32 %v417_v28, %v860_v35  ;;  %v408_v5 = vadd.f32 %v406_v29, %v396_v63  ;;  %v409_v7 = vadd.f32 %v407_v59, %v397_v0 }
 0x14c   :  { %v421_v11 = vadd.f32 %v419_v32, %v409_v7 }
 0x14e   :  { %v423_v16 = vpop.permute.xlu1 %422  ;;  %v447_v26 = vpop.permute.xlu2 %446 }
 0x14f   :  { %v426_v57 = vsel %vm186_vm4, %v423_v16, %v425_v9  ;;  %v427_v58 = vsel %vm186_vm4, %v425_v9, %v423_v16  ;;  %v420_v9 = vadd.f32 %v418_v3, %v408_v5 }
 0x150   :  { %v428_v25 = vmul.f32 %v427_v58, %v189_v14  ;;  %v429_v31 = vmul.f32 %v426_v57, %v190_v15  ;;  %v450_v14 = vsel %vm224_vm6, %v447_v26, %v982_v13  ;;  %v451_v15 = vsel %vm224_vm6, %v982_v13, %v447_v26  ;;  %v527_v58 = vld [vmem:[#allocation2 + $0x28] sm:$0xff] }
 0x151   :  { %v452_v13 = vmul.f32 %v450_v14, %v227_v39  ;;  %v453_v16 = vmul.f32 %v451_v15, %v228_v44  ;;  %530 = vst [vmem:[#allocation8 + $0x28] sm:$0xff] %v527_v58 }
 0x152   :  { %v430_v10 = vmul.f32 %v428_v25, %v848_v30  ;;  %v431_v35 = vmul.f32 %v429_v31, %v848_v30 }
 0x153   :  { %v454_v26 = vmul.f32 %v452_v13, %v866_v37 }
 0x154   :  { %v432_v30 = vadd.f32 %v430_v10, %v420_v9  ;;  %v433_v17 = vadd.f32 %v431_v35, %v421_v11 }
 0x156   :  { %v435_v53 = vpop.permute.xlu1 %434  ;;  %v461_v45 = vpop.permute.xlu2 %460 }
 0x157   :  { %v438_v1 = vsel %vm205_vm5, %v435_v53, %v437_v52  ;;  %v439_v2 = vsel %vm205_vm5, %v437_v52, %v435_v53 }
 0x158   :  { %v440_v4 = vmul.f32 %v438_v1, %v208_v20  ;;  %v441_v6 = vmul.f32 %v439_v2, %v209_v36 }
 0x15a   :  { %v442_v12 = vmul.f32 %v440_v4, %v858_v34  ;;  %v443_v52 = vmul.f32 %v441_v6, %v858_v34  ;;  %v455_v34 = vmul.f32 %v453_v16, %v866_v37 }
 0x15c   :  { %v444_v23 = vadd.f32 %v442_v12, %v432_v30  ;;  %v445_v24 = vadd.f32 %v443_v52, %v433_v17 }
 0x15e   :  { %v459_v8 = vpop.permute.xlu1 %458  ;;  %v473_v27 = vpop.permute.xlu2 %472  ;;  %v457_v60 = vadd.f32 %v455_v34, %v445_v24 }
 0x15f   :  { %v462_v20 = vsel %vm243_vm7, %v459_v8, %v461_v45  ;;  %v463_v36 = vsel %vm243_vm7, %v461_v45, %v459_v8 }
 0x160   :  { %v464_v18 = vmul.f32 %v462_v20, %v246_v61  ;;  %v465_v19 = vmul.f32 %v463_v36, %v247_v62  ;;  %v456_v62 = vadd.f32 %v454_v26, %v444_v23 }
 0x162   :  { %v466_v39 = vmul.f32 %v464_v18, %v873_v40  ;;  %v467_v41 = vmul.f32 %v465_v19, %v873_v40 }
 0x164   :  { %v468_v46 = vadd.f32 %v466_v39, %v456_v62  ;;  %v469_v33 = vadd.f32 %v467_v41, %v457_v60 }
 0x166   :  { %v471_v44 = vpop.permute.xlu1 %470 }
 0x167   :  { %v474_v43 = vsel %vm262_vm8, %v471_v44, %v473_v27  ;;  %v475_v48 = vsel %vm262_vm8, %v473_v27, %v471_v44 }
 0x168   :  { %v476_v49 = vmul.f32 %v989_v22, %v474_v43  ;;  %v477_v61 = vmul.f32 %v991_v21, %v475_v48  ;;  %v334_v22 = vld [vmem:[#allocation2 + $0x8] sm:$0xff]  ;;  %v526_v21 = vld [vmem:[#allocation2 + $0x20] sm:$0xff] }
 0x169   :  { %336 = vst [vmem:[#allocation8 + $0x8] sm:$0xff] %v334_v22 }
 0x16a   :  { %v478_v37 = vmul.f32 %v476_v49, %v871_v38  ;;  %v479_v50 = vmul.f32 %v477_v61, %v871_v38  ;;  %v333_v38 = vld [vmem:[#allocation2] sm:$0xff]  ;;  %529 = vst [vmem:[#allocation8 + $0x20] sm:$0xff] %v526_v21 }
 0x16b   :  { %335 = vst [vmem:[#allocation8] sm:$0xff] %v333_v38 }
 0x16c   :  { %v480_v40 = vadd.f32 %v478_v37, %v468_v46  ;;  %v481_v53 = vadd.f32 %v479_v50, %v469_v33 }
 0x16e   :  { %v288_v51 = vpop.permute.xlu1 %287  ;;  %v482_v57 = vadd.f32 %v480_v40, %v1005_v42  ;;  %v483_v47 = vadd.f32 %v481_v53, %v1005_v42 }
 0x16f   :  { %555 = vmatmul.msk.f32.vlgmr.msra.gmra.mxu2 %vm72_vm0, %v288_v51  ;;  %556 = vmatmul.msk.f32.vlgmr.msra.gmra.mxu3 %vm72_vm0, %v288_v51 }
 0x170   :  { %499 = vmatpush.msrb.mxu2 %v482_v57  ;;  %519 = vmatpush.msrb.mxu3 %v483_v47 }
 0x177   :  { %559 = vmatmul.msk.f32.vlgmr.msrb.gmra.mxu2 %vm72_vm0, %v288_v51  ;;  %560 = vmatmul.msk.f32.vlgmr.msrb.gmra.mxu3 %vm72_vm0, %v288_v51 }
 0x188   :  { %v285_v54 = vpop.permute.xlu2 %284 }
 0x1f2   :  { %v308_v42 = vpop.f32.mrf.mxu2  ;;  %v328_v55 = vpop.f32.mrf.mxu3 }
 0x1f3   :  { %v309_v28 = vadd.f32 %v308_v42, %v285_v54  ;;  %v329_v56 = vadd.f32 %v328_v55, %v285_v54 }
 0x1f5   :  { %v331_v29 = vmax.f32 %v309_v28, 0.0  ;;  %v332_v59 = vmax.f32 %v329_v56, 0.0 }
 0x1f7   :  { %337 = vst [vmem:[#allocation8 + $0x10] sm:$0xff] %v331_v29 }
 0x1f8   :  { %338 = vst [vmem:[#allocation8 + $0x18] sm:$0xff] %v332_v59 }
 0x1fa   :  { %v501_v1 = vpop.f32.mrf.mxu2  ;;  %v521_v2 = vpop.f32.mrf.mxu3 }
 0x1fb   :  { %v502_v25 = vadd.f32 %v501_v1, %v285_v54  ;;  %v522_v31 = vadd.f32 %v521_v2, %v285_v54 }
 0x1fd   :  { %v524_v63 = vmax.f32 %v502_v25, 0.0  ;;  %v525_v0 = vmax.f32 %v522_v31, 0.0 }
 0x1ff   :  { %531 = vst [vmem:[#allocation8 + $0x30] sm:$0xff] %v524_v63 }
 0x200   :  { %532 = vst [vmem:[#allocation8 + $0x38] sm:$0xff] %v525_v0 }
 0x201   :  { %545 = dma.vmem_to_hbm [thread:$0]  %s538_s8, 1024, %s540_s11, [#allocation4], %s732_s12, %s732_s12, %s733_s13  }
 0x202   :  { %704 = dma.done.wait [#allocation4], 1024  }
 0x203   :  { %705 = vsyncadd [#allocation4], 4294966272 }
 0x204   :  { %550 = vsyncpa [#allocation3], 1 }
 0x205   :  { %551 = vsyncpa [#allocation6], 1 }
 0x206   :  { %552 = vsyncpa [#allocation4], 1 }

</bundles_post_ra>
